<compile_context>
chip_gen: v6e
topology: v6e:2x2x1
jax: 0.10.0
libtpu: 0.0.40
codegen_flags: <defaults>
</compile_context>

<pallas_src>
import jax
import jax.numpy as jnp
from jax.experimental import pallas as pl
from jax.experimental.pallas import tpu as pltpu


def _attention_kernel(enc_ref, hb_ref, mask_ref, we_ref, v_ref, out_ref):
    # enc_ref : (S, TB, E2)  encoder outputs for this batch group (native seq-major)
    # hb_ref  : (TB, Dp)     hidden @ W_h^T + bias, Dout zero-padded to Dp
    # mask_ref: (TB, S)      int32 mask (0 = pad position)
    # we_ref  : (E2, Dp)     encoder-part of fc_attn weight (transposed, padded)
    # v_ref   : (1, Dp)      fc_v weight row (padded)
    # out_ref : (TB, S)      softmax attention weights
    S, TB, E2 = enc_ref.shape
    Dp = we_ref.shape[1]

    # One real-M MXU matmul for the whole batch group: (S*TB, E2) @ (E2, Dp).
    enc2 = enc_ref[...].reshape(S * TB, E2)
    e_proj = jnp.dot(enc2, we_ref[...], preferred_element_type=jnp.float32)  # (S*TB, Dp)

    # energy = tanh(enc-proj + hidden-proj + bias)  (hidden-proj/bias precomputed in hb)
    energy = jnp.tanh(e_proj.reshape(S, TB, Dp) + hb_ref[...][None, :, :])   # (S, TB, Dp)

    # fc_v: contract Dp without materializing a transpose of energy
    scores = jnp.sum(energy * v_ref[...][None, :, :], axis=-1)               # (S, TB)

    # batch-major for native mask layout + lane-wise softmax over src_len
    scores = scores.T                                                        # (TB, S)
    scores = jnp.where(mask_ref[...] == 0, jnp.float32(-1e10), scores)

    scores = scores - jnp.max(scores, axis=-1, keepdims=True)
    p = jnp.exp(scores)
    p = p * pl.reciprocal(jnp.sum(p, axis=-1, keepdims=True), approx=False)
    out_ref[...] = p.astype(out_ref.dtype)


def _pick_tb(batch, src_len, e2, d_pad, vmem_budget_bytes=8 << 20):
    """Batch-tile size: largest multiple-of-8 divisor of `batch` whose double-buffered
    enc tile (+ energy scratch) stays inside a conservative VMEM budget, preferring at
    least 2 grid steps (v7x has 2 TensorCores).  Falls back to TB == batch (block dim
    equal to the full array dim is always a legal BlockSpec)."""
    per_b = 4 * (2 * src_len * e2 + src_len * d_pad + 4 * src_len)  # bytes / batch elem
    cap = max(1, vmem_budget_bytes // per_b)
    cands = [tb for tb in range(8, batch + 1, 8) if batch % tb == 0 and tb <= cap]
    if cands:
        multi = [tb for tb in cands if batch // tb >= 2]
        return max(multi) if multi else max(cands)
    return batch


def attention_forward(hidden, encoder_outputs, mask, w_attn, b_attn, w_v, *, tb=None):
    """hidden: (B, D); encoder_outputs: (S, B, E2) (native layout); mask: (B, S)."""
    S, B, E2 = encoder_outputs.shape
    D = hidden.shape[1]
    Dout = w_attn.shape[0]
    Dp = ((Dout + 127) // 128) * 128          # pad fc_attn output dim to full lanes

    # cat order is [hidden(D), enc(E2)] -> split fc_attn weight accordingly.
    wh_t = w_attn[:, :D].T                    # (D, Dout)
    we_t = w_attn[:, D:].T                    # (E2, Dout)

    # Zero-pad Dout -> Dp. Padded columns yield tanh(0 + 0) * 0 = 0 contributions.
    we_p = jnp.zeros((E2, Dp), jnp.float32).at[:, :Dout].set(we_t)
    v_p = jnp.zeros((1, Dp), jnp.float32).at[:, :Dout].set(w_v.reshape(1, Dout))

    # Hoisted hidden projection + bias: one (B, D) @ (D, Dout) XLA matmul.
    hb = jnp.dot(hidden, wh_t, precision=jax.lax.Precision.HIGHEST) + b_attn  # (B, Dout)
    hb_p = jnp.zeros((B, Dp), jnp.float32).at[:, :Dout].set(hb)

    mask_i = mask.astype(jnp.int32)

    if tb is None:
        tb = _pick_tb(B, S, E2, Dp)
    assert B % tb == 0, "batch tile must divide batch"
    grid = (B // tb,)

    out = pl.pallas_call(
        _attention_kernel,
        out_shape=jax.ShapeDtypeStruct((B, S), jnp.float32),
        grid_spec=pltpu.PrefetchScalarGridSpec(
            num_scalar_prefetch=0,
            grid=grid,
            in_specs=[
                pl.BlockSpec((S, tb, E2), lambda g: (0, g, 0)),  # enc, native layout
                pl.BlockSpec((tb, Dp), lambda g: (g, 0)),        # hidden-proj + bias
                pl.BlockSpec((tb, S), lambda g: (g, 0)),         # mask
                pl.BlockSpec((E2, Dp), lambda g: (0, 0)),        # W_enc (resident)
                pl.BlockSpec((1, Dp), lambda g: (0, 0)),         # v     (resident)
            ],
            out_specs=pl.BlockSpec((tb, S), lambda g: (g, 0)),
        ),
        compiler_params=pltpu.CompilerParams(dimension_semantics=("parallel",)),
    )(encoder_outputs, hb_p, mask_i, we_p, v_p)
    return out                                 # (B, S)


def _reference(hidden, encoder_outputs, mask, w_attn, b_attn, w_v):
    S, B, _ = encoder_outputs.shape
    h_rep = jnp.repeat(hidden[:, None, :], S, axis=1)            # (B, S, D)
    enc = jnp.transpose(encoder_outputs, (1, 0, 2))              # (B, S, E2)
    cat = jnp.concatenate([h_rep, enc], axis=2)                  # (B, S, D+E2)
    energy = jnp.tanh(
        jnp.dot(cat, w_attn.T, precision=jax.lax.Precision.HIGHEST) + b_attn)
    attn = jnp.dot(energy, w_v.T, precision=jax.lax.Precision.HIGHEST)[..., 0]
    attn = jnp.where(mask == 0, -1e10, attn)
    return jax.nn.softmax(attn, axis=1)


if __name__ == "__main__":
    enc_hid_dim = 16
    dec_hid_dim = 32
    src_len = 8
    batch = 2
    E2 = enc_hid_dim * 2

    key = jax.random.PRNGKey(0)
    k1, k2, k3, k4, k5 = jax.random.split(key, 5)

    # Parameters (shapes match nn.Linear(enc*2+dec, dec) and nn.Linear(dec, 1, bias=False))
    w_attn = jax.random.normal(k1, (dec_hid_dim, E2 + dec_hid_dim), jnp.float32) * 0.1
    b_attn = jax.random.normal(k2, (dec_hid_dim,), jnp.float32) * 0.1
    w_v = jax.random.normal(k3, (1, dec_hid_dim), jnp.float32) * 0.1

    # Inputs
    hidden = jax.random.normal(k4, (batch, dec_hid_dim), jnp.float32)
    encoder_outputs = jax.random.normal(k5, (src_len, batch, E2), jnp.float32)
    lengths = jnp.array([src_len, 5], dtype=jnp.int32)
    mask = (jnp.arange(src_len)[None, :] < lengths[:, None]).astype(jnp.int32)  # (B, S)

    out = attention_forward(hidden, encoder_outputs, mask, w_attn, b_attn, w_v)
    out = jax.block_until_ready(out)

    ref = _reference(hidden, encoder_outputs, mask, w_attn, b_attn, w_v)
    assert out.shape == (batch, src_len)
    assert jnp.allclose(out, ref, atol=1e-5, rtol=1e-5), "mismatch vs reference"

    print("KERNEL_OK")
</pallas_src>

<mosaic_0001>
module attributes {stable_mosaic.version = 11 : i64} {
  func.func @_attention_kernel(%arg0: i32, %arg1: memref<8x2x32xf32, #tpu.memory_space<vmem>>, %arg2: memref<2x128xf32, #tpu.memory_space<vmem>>, %arg3: memref<2x8xi32, #tpu.memory_space<vmem>>, %arg4: memref<32x128xf32, #tpu.memory_space<vmem>>, %arg5: memref<1x128xf32, #tpu.memory_space<vmem>>, %arg6: memref<2x8xf32, #tpu.memory_space<vmem>>) attributes {dimension_semantics = [#tpu.dimension_semantics<parallel>], iteration_bounds = array<i64: 1>, scalar_prefetch = 0 : i64, scratch_operands = 0 : i64, tpu.core_type = #tpu.core_type<tc>, window_params = [{transform_indices = @transform_0, window_bounds = array<i64: 8, 2, 32>}, {transform_indices = @transform_1, window_bounds = array<i64: 2, 128>}, {transform_indices = @transform_2, window_bounds = array<i64: 2, 8>}, {pipeline_mode = #tpu.pipeline_mode<synchronous>, transform_indices = @transform_3, window_bounds = array<i64: 32, 128>}, {pipeline_mode = #tpu.pipeline_mode<synchronous>, transform_indices = @transform_4, window_bounds = array<i64: 1, 128>}, {transform_indices = @transform_5, window_bounds = array<i64: 2, 8>}]} {
    %c0 = arith.constant 0 : index
    %c0_0 = arith.constant 0 : index
    %c0_1 = arith.constant 0 : index
    %0 = vector.load %arg1[%c0, %c0_0, %c0_1] : memref<8x2x32xf32, #tpu.memory_space<vmem>>, vector<8x2x32xf32>
    %1 = vector.shape_cast %0 : vector<8x2x32xf32> to vector<16x32xf32>
    %c0_2 = arith.constant 0 : index
    %c0_3 = arith.constant 0 : index
    %2 = vector.load %arg4[%c0_2, %c0_3] : memref<32x128xf32, #tpu.memory_space<vmem>>, vector<32x128xf32>
    %cst = arith.constant dense<0.000000e+00> : vector<16x128xf32>
    %3 = tpu.matmul %1, %2, %cst {dimension_numbers = #tpu.dot_dimension_numbers<[1], [0], [0], [1], [0, 0, 1, 1], [], []>} : vector<16x32xf32>, vector<32x128xf32>, vector<16x128xf32> -> vector<16x128xf32>
    %4 = vector.shape_cast %3 : vector<16x128xf32> to vector<8x2x128xf32>
    %c0_4 = arith.constant 0 : index
    %c0_5 = arith.constant 0 : index
    %5 = vector.load %arg2[%c0_4, %c0_5] : memref<2x128xf32, #tpu.memory_space<vmem>>, vector<2x128xf32>
    %6 = vector.shape_cast %5 : vector<2x128xf32> to vector<1x2x128xf32>
    %7 = vector.broadcast %6 : vector<1x2x128xf32> to vector<8x2x128xf32>
    %8 = arith.addf %4, %7 : vector<8x2x128xf32>
    %9 = math.tanh %8 : vector<8x2x128xf32>
    %c0_6 = arith.constant 0 : index
    %c0_7 = arith.constant 0 : index
    %10 = vector.load %arg5[%c0_6, %c0_7] : memref<1x128xf32, #tpu.memory_space<vmem>>, vector<1x128xf32>
    %11 = vector.shape_cast %10 : vector<1x128xf32> to vector<1x1x128xf32>
    %12 = vector.broadcast %11 : vector<1x1x128xf32> to vector<8x2x128xf32>
    %13 = arith.mulf %9, %12 : vector<8x2x128xf32>
    %cst_8 = arith.constant dense<0.000000e+00> : vector<8x2xf32>
    %14 = vector.multi_reduction <add>, %13, %cst_8 [2] : vector<8x2x128xf32> to vector<8x2xf32>
    %15 = tpu.transpose %14, [1, 0] : vector<8x2xf32> -> vector<2x8xf32>
    %c0_9 = arith.constant 0 : index
    %c0_10 = arith.constant 0 : index
    %16 = vector.load %arg3[%c0_9, %c0_10] : memref<2x8xi32, #tpu.memory_space<vmem>>, vector<2x8xi32>
    %c0_i32 = arith.constant 0 : i32
    %17 = vector.broadcast %c0_i32 : i32 to vector<2x8xi32>
    %18 = arith.cmpi eq, %16, %17 : vector<2x8xi32>
    %cst_11 = arith.constant -1.000000e+10 : f32
    %19 = vector.broadcast %cst_11 : f32 to vector<2x8xf32>
    %20 = arith.select %18, %19, %15 : vector<2x8xi1>, vector<2x8xf32>
    %cst_12 = arith.constant dense<0xFF800000> : vector<2xf32>
    %21 = vector.multi_reduction <maximumf>, %20, %cst_12 [1] : vector<2x8xf32> to vector<2xf32>
    %22 = vector.shape_cast %21 : vector<2xf32> to vector<2x1xf32>
    %23 = vector.broadcast %22 : vector<2x1xf32> to vector<2x8xf32>
    %24 = arith.subf %20, %23 : vector<2x8xf32>
    %25 = math.exp %24 : vector<2x8xf32>
    %cst_13 = arith.constant dense<0.000000e+00> : vector<2xf32>
    %26 = vector.multi_reduction <add>, %25, %cst_13 [1] : vector<2x8xf32> to vector<2xf32>
    %27 = vector.shape_cast %26 : vector<2xf32> to vector<2x1xf32>
    %28 = tpu.reciprocal %27 : vector<2x1xf32> -> vector<2x1xf32>
    %29 = vector.broadcast %28 : vector<2x1xf32> to vector<2x8xf32>
    %30 = arith.mulf %25, %29 : vector<2x8xf32>
    %c0_14 = arith.constant 0 : index
    %c0_15 = arith.constant 0 : index
    %31 = vector.load %arg6[%c0_14, %c0_15] : memref<2x8xf32, #tpu.memory_space<vmem>>, vector<2x8xf32>
    tpu.vector_store %arg6[%c0_14, %c0_15], %30 {strides = array<i32>} : memref<2x8xf32, #tpu.memory_space<vmem>>, vector<2x8xf32>,
    return
  }
  func.func @transform_0(%arg0: i32) -> (i32, i32, i32) {
    %c0_i32 = arith.constant 0 : i32
    %c0_i32_0 = arith.constant 0 : i32
    %c0_i32_1 = arith.constant 0 : i32
    return %c0_i32, %arg0, %c0_i32_0 : i32, i32, i32
  }
  func.func @transform_1(%arg0: i32) -> (i32, i32) {
    %c0_i32 = arith.constant 0 : i32
    %c0_i32_0 = arith.constant 0 : i32
    return %arg0, %c0_i32 : i32, i32
  }
  func.func @transform_2(%arg0: i32) -> (i32, i32) {
    %c0_i32 = arith.constant 0 : i32
    %c0_i32_0 = arith.constant 0 : i32
    return %arg0, %c0_i32 : i32, i32
  }
  func.func @transform_3(%arg0: i32) -> (i32, i32) {
    %c0_i32 = arith.constant 0 : i32
    %c0_i32_0 = arith.constant 0 : i32
    %c0_i32_1 = arith.constant 0 : i32
    return %c0_i32, %c0_i32_0 : i32, i32
  }
  func.func @transform_4(%arg0: i32) -> (i32, i32) {
    %c0_i32 = arith.constant 0 : i32
    %c0_i32_0 = arith.constant 0 : i32
    %c0_i32_1 = arith.constant 0 : i32
    return %c0_i32, %c0_i32_0 : i32, i32
  }
  func.func @transform_5(%arg0: i32) -> (i32, i32) {
    %c0_i32 = arith.constant 0 : i32
    %c0_i32_0 = arith.constant 0 : i32
    return %arg0, %c0_i32 : i32, i32
  }
}

</mosaic_0001>

<bundles_post_ra>
// kernel: tpu_custom_call.1
= control target key start
LH: loop header
LB: loop body
LE: loop exit
PB: predicated region body
PF: predicated region fallthrough
CT: control target
= control target key end

     0   :  { %10 = vsyncpa [#allocation3], 0  ;;  %s626_s0 = inlined_call_operand.hbm [shape: f32[8,2,32], index: 0, kind: input, shape index: {}]   ;;  %s627_s1 = inlined_call_operand.hbm [shape: f32[2,128], index: 1, kind: input, shape index: {}]   ;;  %s628_s2 = inlined_call_operand.vmem [shape: s32[2,8], index: 2, kind: input, shape index: {}]   ;;  %s629_s3 = inlined_call_operand.hbm [shape: f32[32,128], index: 3, kind: input, shape index: {}]   ;;  %s630_s4 = inlined_call_operand.vmem [shape: f32[1,128], index: 4, kind: input, shape index: {}]   ;;  %s631_s5 = inlined_call_operand.hbm [shape: f32[2,8], index: 5, kind: output, shape index: {}]  }
   0x1   :  { %11 = vsyncpa [#allocation6], 0 }
   0x2   :  { %12 = vsyncpa [#allocation4], 0  ;;  %s552_s18 = smov [#allocation5]   ;;  %s553_s20 = smov [#allocation2]  }
   0x3   :  { %s31_s19 = sshll.u32 %s552_s18, 4  ;;  %s18_s21 = sshll.u32 %s553_s20, 4  ;;  %s32_s19 = int_to_ptr.vmem [resolvable:$true] %s31_s19  ;;  %s19_s21 = int_to_ptr.vmem [resolvable:$true] %s18_s21 }
   0x4   :  { %s474_s22 = scalar_lea.vmem %s32_s19, 32  ;;  %p479_p1 = scmp.lt.s32.totalorder %s32_s19, %s32_s19 }
   0x5   :  { %p475_p0 = scmp.ne.s32.totalorder %s32_s19, %s474_s22  ;;  %p480_p2 = scmp.lt.s32.totalorder %s474_s22, %s474_s22 }
   0x7   :  { %p481_p3 = por %p480_p2, %p479_p1 }
   0x9   :  { %p482_p4 = pnand %p481_p3, %p475_p0 }
   0xb   :  { %485 = shalt.err (!%p482_p4)
}
   0xc   :  { %34 = dma.hbm_to_vmem [thread:$0]  %s627_s1, 32, %s32_s19, [#allocation6]  }
   0xd   :  { %s494_s25 = scalar_lea.vmem %s19_s21, 256  ;;  %p499_p6 = scmp.lt.s32.totalorder %s19_s21, %s19_s21 }
   0xe   :  { %p495_p5 = scmp.ne.s32.totalorder %s19_s21, %s494_s25  ;;  %p500_p7 = scmp.lt.s32.totalorder %s494_s25, %s494_s25 }
  0x10   :  { %p501_p8 = por %p500_p7, %p499_p6 }
  0x12   :  { %p502_p9 = pnand %p501_p8, %p495_p5 }
  0x14   :  { %505 = shalt.err (!%p502_p9)
}
  0x15   :  { %s554_s26 = smov 32   ;;  %s555_s27 = smov 2  }
  0x16   :  { %24 = dma.hbm_to_vmem [thread:$0]  %s626_s0, 256, %s19_s21, [#allocation3], %s554_s26, %s554_s26, %s555_s27  }
  0x17   :  { %s556_s30 = smov [#allocation7]  }
  0x18   :  { %s42_s6 = sshll.u32 %s556_s30, 4  ;;  %s43_s6 = int_to_ptr.vmem [resolvable:$true] %s42_s6 }
  0x19   :  { %s514_s7 = scalar_lea.vmem %s43_s6, 512  ;;  %p519_p11 = scmp.lt.s32.totalorder %s43_s6, %s43_s6 }
  0x1a   :  { %p515_p10 = scmp.ne.s32.totalorder %s43_s6, %s514_s7  ;;  %p520_p12 = scmp.lt.s32.totalorder %s514_s7, %s514_s7 }
  0x1c   :  { %p521_p13 = por %p520_p12, %p519_p11 }
  0x1e   :  { %p522_p0 = pnand %p521_p13, %p515_p10 }
  0x20   :  { %525 = shalt.err (!%p522_p0)
}
  0x21   :  { %s557_s1 = smov 128   ;;  %s558_s8 = smov 8  }
  0x22   :  { %48 = dma.hbm_to_vmem [thread:$0]  %s629_s3, 512, %s43_s6, [#allocation6], %s557_s1, %s557_s1, %s558_s8  }
  0x23   :  { %546 = dma.done.wait [#allocation3], 256  }
  0x24   :  { %547 = vsyncadd [#allocation3], 4294967040 }
  0x25   :  { %548 = dma.done.wait [#allocation6], 544  }
  0x26   :  { %549 = vsyncadd [#allocation6], 4294966752  ;;  %v85_v0 = vlaneseq  ;;  %v559_v1 = vmov 1983009808   ;;  %v71_v5 = vld [vmem:[#allocation7 + $0x18] sm:$0xff]  ;;  %v70_v6 = vld [vmem:[#allocation7 + $0x10] sm:$0xff] }
  0x27   :  { %v83_v2 = vunpack.c.l.s4 %v559_v1  ;;  %425 = vmatprep.subr.mxu0 %v71_v5  ;;  %v69_v8 = vld [vmem:[#allocation7 + $0x8] sm:$0xff]  ;;  %v61_v10 = vld [vmem:[#allocation2 + $0x2] sm:$0x3]  ;;  %v62_v11 = vld [vmem:[#allocation2 + $0x4] sm:$0x3]  ;;  %vm114_vm0 = vcmask 261120  }
  0x28   :  { %v601_v4 = vshrl.u32 %v85_v0, 7  ;;  %v60_v9 = vld [vmem:[#allocation2] sm:$0x3]  ;;  %426 = vmatpush3.msra.mxu0 %v71_v5  ;;  %v63_v12 = vld [vmem:[#allocation2 + $0x6] sm:$0x3]  ;;  %v68_v19 = vld [vmem:[#allocation7] sm:$0xff] }
  0x29   :  { %v84_v3 = vunpack.c.0.s8 %v83_v2  ;;  %v80_v13 = vcombine.low %v60_v9, %v61_v10  ;;  %v64_v14 = vld [vmem:[#allocation2 + $0x8] sm:$0x3]  ;;  %427 = vmatprep.subr.mxu0 %v70_v6  ;;  %v81_v15 = vcombine.low %v62_v11, %v63_v12  ;;  %v65_v16 = vld [vmem:[#allocation2 + $0xa] sm:$0x3]  ;;  %v66_v17 = vld [vmem:[#allocation2 + $0xc] sm:$0x3] }
  0x2a   :  { %v67_v18 = vld [vmem:[#allocation2 + $0xe] sm:$0x3]  ;;  %428 = vmatpush3.msra.mxu0 %v70_v6  ;;  %v97_v21 = vcombine.low %v64_v14, %v65_v16  ;;  %v238_v35 = vld [vmem:[#allocation5] sm:$0x3]  ;;  %v418_v50 = vld [vmem:[%s630_s4] ss:$0 sm:$0xff] }
  0x2b   :  { %v87_v7 = vsub.s32 %v84_v3, %v601_v4  ;;  %v98_v22 = vcombine.low %v66_v17, %v67_v18  ;;  %429 = vmatprep.subr.mxu0 %v69_v8  ;;  %vm270_vm1 = vcmask 1041408   ;;  %v304_v12 = vand.u32 127, %v85_v0  ;;  %s560_s12 = smov [#allocation8]  }
  0x2c   :  { %430 = vmatpush3.msra.mxu0 %v69_v8  ;;  %vm337_vm2 = vcmask 1041409   ;;  %vm339_vm3 = vcmask 1042434   ;;  %vm341_vm4 = vcmask 1043459   ;;  %vm343_vm5 = vcmask 1044484   ;;  %s406_s13 = sshll.u32 %s560_s12, 4  ;;  %s407_s13 = int_to_ptr.vmem [resolvable:$true] %s406_s13 }
  0x2d   :  { %v88_v20 = vrot.slane %v80_v13, %v87_v7  ;;  %v95_v23 = vrot.slane %v81_v15, %v87_v7  ;;  %v105_v24 = vrot.slane %v97_v21, %v87_v7  ;;  %v112_v25 = vrot.slane %v98_v22, %v87_v7  ;;  %431 = vmatprep.subr.mxu0 %v68_v19  ;;  %p531_p2 = scmp.lt.s32.totalorder %s407_s13, %s407_s13 }
  0x2e   :  { %432 = vmatpush3.msra.mxu0 %v68_v19  ;;  %v307_v15 = vsub.s32 %v304_v12, %v601_v4  ;;  %vm345_vm6 = vcmask 1045509   ;;  %vm347_vm7 = vcmask 1046534   ;;  %vm349_vm8 = vcmask 1047559  }
  0x2f   :  { %v96_v26 = vcombine.low %v88_v20, %v95_v23  ;;  %v113_v27 = vcombine.low %v105_v24, %v112_v25  ;;  %vm387_vm10 = vcmask 58368  }
  0x31   :  { %433 = vmatprep.mubr.msk.f32.mxu0 %vm114_vm0, %v96_v26 }
  0x32   :  { %434 = vmatmul.mubr.msk.f32.vlgmr.msra.gmra.mxu0 %vm114_vm0, %v113_v27 }
  0xf2   :  { %v435_v28 = vpop.f32.mrf.mxu0 }
  0xf3   :  { %v213_v29 = vcombine.high %v435_v28, %v435_v28  ;;  %v220_v30 = vrot.slane %v435_v28, %v87_v7 }
  0xf4   :  { %v185_v31 = vpop.f32.mrf.mxu0 }
  0xf5   :  { %v228_v32 = vcombine.high %v220_v30, %v220_v30  ;;  %v196_v33 = vcombine.high %v185_v31, %v185_v31  ;;  %v227_v34 = vrot.slane %v213_v29, %v87_v7  ;;  %v203_v36 = vrot.slane %v185_v31, %v87_v7 }
  0xf6   :  { %v243_v45 = vadd.f32 %v238_v35, %v220_v30 }
  0xf7   :  { %v244_v37 = vadd.f32 %v238_v35, %v228_v32  ;;  %v210_v38 = vrot.slane %v196_v33, %v87_v7  ;;  %v211_v39 = vcombine.high %v203_v36, %v203_v36  ;;  %v239_v40 = vadd.f32 %v238_v35, %v203_v36 }
  0xf8   :  { %v229_v41 = vcombine.high %v227_v34, %v227_v34  ;;  %v245_v48 = vadd.f32 %v238_v35, %v227_v34 }
  0xf9   :  { %446 = vtanh.f32 %v244_v37  ;;  %v212_v42 = vcombine.high %v210_v38, %v210_v38  ;;  %v240_v43 = vadd.f32 %v238_v35, %v211_v39  ;;  %v241_v44 = vadd.f32 %v238_v35, %v210_v38 }
  0xfa   :  { %448 = vtanh.f32 %v239_v40  ;;  %v246_v47 = vadd.f32 %v238_v35, %v229_v41 }
  0xfb   :  { %v242_v46 = vadd.f32 %v238_v35, %v212_v42  ;;  %450 = vtanh.f32 %v240_v43  ;;  %v384_v35 = vld [vmem:[%s628_s2] sm:$0x3]  ;;  %s526_s2 = scalar_lea.vmem %s407_s13, 32 }
  0xfc   :  { %452 = vtanh.f32 %v241_v44  ;;  %vm385_vm9 = vcmp.eq.s32.totalorder %v384_v35, 0  ;;  %p527_p1 = scmp.ne.s32.totalorder %s407_s13, %s526_s2  ;;  %p532_p3 = scmp.lt.s32.totalorder %s526_s2, %s526_s2 }
  0xfd   :  { %454 = vtanh.f32 %v242_v46 }
  0xfe   :  { %456 = vtanh.f32 %v243_v45  ;;  %p533_p4 = por %p532_p3, %p531_p2 }
  0xff   :  { %458 = vtanh.f32 %v246_v47 }
 0x100   :  { %460 = vtanh.f32 %v245_v48  ;;  %p534_p5 = pnand %p533_p4, %p527_p1 }
 0x106   :  { %v447_v49 = vpop.eup %446 }
 0x107   :  { %v267_v51 = vmul.f32 %v447_v49, %v418_v50  ;;  %v449_v52 = vpop.eup %448 }
 0x108   :  { %v451_v54 = vpop.eup %450  ;;  %v262_v55 = vmul.f32 %v449_v52, %v418_v50 }
 0x109   :  { %v286_v53 = vsel %vm270_vm1, %v267_v51, 0.0  ;;  %v453_v56 = vpop.eup %452  ;;  %v263_v59 = vmul.f32 %v451_v54, %v418_v50 }
 0x10a   :  { %287 = vadd.xlane.f32.xlu1 %v286_v53  ;;  %v455_v57 = vpop.eup %454  ;;  %v271_v58 = vsel %vm270_vm1, %v262_v55, 0.0  ;;  %v264_v60 = vmul.f32 %v453_v56, %v418_v50 }
 0x10b   :  { %v457_v61 = vpop.eup %456  ;;  %272 = vadd.xlane.f32.xlu0 %v271_v58  ;;  %v265_v63 = vmul.f32 %v455_v57, %v418_v50  ;;  %v274_v2 = vsel %vm270_vm1, %v263_v59, 0.0 }
 0x10c   :  { %v277_v62 = vsel %vm270_vm1, %v264_v60, 0.0  ;;  %v459_v1 = vpop.eup %458  ;;  %v266_v3 = vmul.f32 %v457_v61, %v418_v50 }
 0x10d   :  { %v461_v5 = vpop.eup %460  ;;  %v280_v6 = vsel %vm270_vm1, %v265_v63, 0.0  ;;  %v269_v7 = vmul.f32 %v459_v1, %v418_v50 }
 0x10e   :  { %278 = vadd.xlane.f32.xlu1 %v277_v62  ;;  %v283_v8 = vsel %vm270_vm1, %v266_v3, 0.0  ;;  %v268_v9 = vmul.f32 %v461_v5, %v418_v50 }
 0x10f   :  { %275 = vadd.xlane.f32.xlu0 %v274_v2  ;;  %v292_v10 = vsel %vm270_vm1, %v269_v7, 0.0 }
 0x110   :  { %v289_v11 = vsel %vm270_vm1, %v268_v9, 0.0 }
 0x112   :  { %281 = vadd.xlane.f32.xlu1 %v280_v6 }
 0x113   :  { %284 = vadd.xlane.f32.xlu0 %v283_v8 }
 0x116   :  { %293 = vadd.xlane.f32.xlu1 %v292_v10 }
 0x117   :  { %290 = vadd.xlane.f32.xlu0 %v289_v11 }
 0x193   :  { %v288_v13 = vpop.xlane.xlu1 %287 }
 0x194   :  { %v273_v14 = vpop.xlane.xlu0 %272  ;;  %v328_v27 = vrot.slane %v288_v13, %v307_v15 }
 0x195   :  { %v308_v19 = vrot.slane %v273_v14, %v307_v15 }
 0x197   :  { %v279_v16 = vpop.xlane.xlu1 %278 }
 0x198   :  { %v276_v17 = vpop.xlane.xlu0 %275  ;;  %v316_v18 = vrot.slane %v279_v16, %v307_v15 }
 0x199   :  { %v312_v20 = vrot.slane %v276_v17, %v307_v15 }
 0x19b   :  { %v282_v21 = vpop.xlane.xlu1 %281  ;;  %v338_v22 = vsel %vm337_vm2, %v312_v20, %v308_v19 }
 0x19c   :  { %v320_v23 = vrot.slane %v282_v21, %v307_v15  ;;  %v340_v24 = vsel %vm339_vm3, %v316_v18, %v338_v22  ;;  %v285_v25 = vpop.xlane.xlu0 %284 }
 0x19d   :  { %v324_v26 = vrot.slane %v285_v25, %v307_v15 }
 0x19e   :  { %v342_v0 = vsel %vm341_vm4, %v320_v23, %v340_v24 }
 0x19f   :  { %v294_v28 = vpop.xlane.xlu1 %293  ;;  %v344_v4 = vsel %vm343_vm5, %v324_v26, %v342_v0 }
 0x1a0   :  { %v291_v29 = vpop.xlane.xlu0 %290  ;;  %v336_v30 = vrot.slane %v294_v28, %v307_v15  ;;  %v346_v31 = vsel %vm345_vm6, %v328_v27, %v344_v4 }
 0x1a1   :  { %v332_v32 = vrot.slane %v291_v29, %v307_v15 }
 0x1a3   :  { %v348_v33 = vsel %vm347_vm7, %v332_v32, %v346_v31 }
 0x1a4   :  { %v350_v34 = vsel %vm349_vm8, %v336_v30, %v348_v33 }
 0x1a5   :  { %352 = vxpose.xlu0.b32.start.end [1/1] (short) (narrow) %v350_v34, 8 }
 0x221   :  { %v368_v36 = vpop.trf.xlu0 }
 0x222   :  { %v386_v37 = vsel %vm385_vm9, -1e+10, %v368_v36 }
 0x223   :  { %v388_v38 = vsel %vm387_vm10, %v386_v37, -inf }
 0x224   :  { %389 = vmax.xlane.f32.xlu1 %v388_v38 }
 0x2ad   :  { %v390_v39 = vpop.xlane.xlu1 %389 }
 0x2ae   :  { %v391_v40 = vsub.f32 %v386_v37, %v390_v39 }
 0x2b0   :  { %v392_v41 = vmul.f32 1.442695, %v391_v40 }
 0x2b2   :  { %462 = vpow2.f32 %v392_v41 }
 0x2bf   :  { %v463_v42 = vpop.eup %462 }
 0x2c0   :  { %v394_v43 = vsel %vm387_vm10, %v463_v42, 0.0 }
 0x2c1   :  { %395 = vadd.xlane.f32.xlu1 %v394_v43 }
 0x34a   :  { %v396_v44 = vpop.xlane.xlu1 %395 }
 0x34b   :  { %464 = vrcp.f32 %v396_v44 }
 0x358   :  { %v465_v45 = vpop.eup %464 }
 0x359   :  { %v398_v46 = vmul.f32 %v465_v45, %v463_v42 }
 0x35b   :  { %399 = vst.msk [vmem:[#allocation8] sm:$0x3] %vm387_vm10, %v398_v46 }
 0x35c   :  { %537 = shalt.err (!%p534_p5)
}
 0x35d   :  { %409 = dma.vmem_to_hbm [thread:$0]  %s407_s13, 32, %s631_s5, [#allocation4]  }
 0x35e   :  { %550 = dma.done.wait [#allocation4], 32  }
 0x35f   :  { %551 = vsyncadd [#allocation4], 4294967264 }
 0x360   :  { %413 = vsyncpa [#allocation3], 1 }
 0x361   :  { %414 = vsyncpa [#allocation6], 1 }
 0x362   :  { %415 = vsyncpa [#allocation4], 1 }

</bundles_post_ra>
